<compile_context>
chip_gen: v7x
topology: tpu7x:2x2x1
jax: 0.10.0
libtpu: 0.0.40
codegen_flags: <defaults>
</compile_context>

<pallas_src>
import jax
import jax.numpy as jnp
from jax.experimental import pallas as pl
from jax.experimental.pallas import tpu as pltpu


def _leaky_relu_05(x):
    # For slope in (0, 1): leaky_relu(x) == max(x, slope*x).
    return jnp.maximum(x, 0.5 * x)


def decoder_kernel(x_ref, w1t_ref, w2t_ref, w3t_ref, o_ref):
    # x_ref:   (TB, final_dim)           -- bf16 (or f32) activations
    # w1t_ref: (final_dim, dim2)         -- [in, out] layout
    # w2t_ref: (dim2, dim1)
    # w3t_ref: (dim1, n_input)
    # o_ref:   (TB, n_input)             -- f32 output
    h = jnp.dot(x_ref[...], w1t_ref[...], preferred_element_type=jnp.float32)
    h = _leaky_relu_05(h)
    h = jnp.dot(h.astype(w2t_ref.dtype), w2t_ref[...],
                preferred_element_type=jnp.float32)
    h = _leaky_relu_05(h)
    out = jnp.dot(h.astype(w3t_ref.dtype), w3t_ref[...],
                  preferred_element_type=jnp.float32)
    o_ref[...] = out.astype(o_ref.dtype)


def prepare_decoder_weights(w1, w2, w3, compute_dtype=jnp.bfloat16):
    """One-time preprocessing (do this at module-init time, not per decode).

    w1 : (dim2, final_dim)   -- nn.Linear(final_dim, dim2, bias=False).weight
    w2 : (dim1, dim2)        -- nn.Linear(dim2, dim1, bias=False).weight
    w3 : (n_input, dim1)     -- nn.Linear(dim1, n_input, bias=False).weight
    Returns weights transposed to [in, out] layout in `compute_dtype`.
    """
    return (w1.T.astype(compute_dtype),
            w2.T.astype(compute_dtype),
            w3.T.astype(compute_dtype))


def _choose_tb(B, final_dim, n_input, weight_bytes,
               act_itemsize=2, out_itemsize=4, budget_bytes=12 << 20):
    """Pick a batch tile: big enough to fill the MXU, small enough for VMEM.

    budget_bytes is conservative (well under v5e's 16 MiB default scoped-VMEM
    limit), accounting for double-buffered x/out blocks plus the (also
    double-buffered, even though their block index is constant) weight slabs.
    """
    tb = min(B, 256)  # 256 fills a v6e/v7x MXU M-pass; also >=2 blocks when B>=512.

    def vmem_estimate(t):
        act = 2 * t * final_dim * act_itemsize      # double-buffered x block
        out = 2 * t * n_input * out_itemsize        # double-buffered out block
        return act + out + 2 * weight_bytes         # weights double-buffered too

    while tb > 8 and vmem_estimate(tb) > budget_bytes:
        tb = max(8, (tb // 2) // 8 * 8)             # keep sublane (8) alignment
    return tb


def autoencoder_decode(x, w1t, w2t, w3t, *, tb=None, compute_dtype=jnp.bfloat16):
    """Pallas implementation of AutoEncoder.decode.

    x   : (B, final_dim) float
    w1t : (final_dim, dim2)   -- pre-transposed (see prepare_decoder_weights)
    w2t : (dim2, dim1)
    w3t : (dim1, n_input)
    returns (B, n_input) in x.dtype
    """
    B, final_dim = x.shape
    dim2 = w1t.shape[1]
    dim1 = w2t.shape[1]
    n_input = w3t.shape[1]

    weight_bytes = (w1t.size * w1t.dtype.itemsize
                    + w2t.size * w2t.dtype.itemsize
                    + w3t.size * w3t.dtype.itemsize)
    if tb is None:
        tb = _choose_tb(B, final_dim, n_input, weight_bytes)

    # Cast activations once in the wrapper: halves x DMA bytes for the kernel.
    x_c = x.astype(compute_dtype)

    grid = (pl.cdiv(B, tb),)

    return pl.pallas_call(
        decoder_kernel,
        out_shape=jax.ShapeDtypeStruct((B, n_input), x.dtype),
        grid_spec=pltpu.PrefetchScalarGridSpec(
            num_scalar_prefetch=0,
            grid=grid,
            in_specs=[
                pl.BlockSpec((tb, final_dim), lambda i: (i, 0)),
                pl.BlockSpec((final_dim, dim2), lambda i: (0, 0)),
                pl.BlockSpec((dim2, dim1), lambda i: (0, 0)),
                pl.BlockSpec((dim1, n_input), lambda i: (0, 0)),
            ],
            out_specs=pl.BlockSpec((tb, n_input), lambda i: (i, 0)),
        ),
        compiler_params=pltpu.CompilerParams(
            dimension_semantics=("parallel",)),
    )(x_c, w1t, w2t, w3t)


def autoencoder_decode_ref_bf16(x, w1, w2, w3, compute_dtype=jnp.bfloat16):
    """Pure-JAX reference that mimics the kernel's bf16-input / f32-accum path."""
    w1t, w2t, w3t = prepare_decoder_weights(w1, w2, w3, compute_dtype)
    h = jnp.dot(x.astype(compute_dtype), w1t, preferred_element_type=jnp.float32)
    h = jnp.maximum(h, 0.5 * h)
    h = jnp.dot(h.astype(compute_dtype), w2t, preferred_element_type=jnp.float32)
    h = jnp.maximum(h, 0.5 * h)
    out = jnp.dot(h.astype(compute_dtype), w3t, preferred_element_type=jnp.float32)
    return out.astype(x.dtype)


def autoencoder_decode_ref_f32(x, w1, w2, w3):
    h = x @ w1.T
    h = jnp.where(h >= 0, h, 0.5 * h)
    h = h @ w2.T
    h = jnp.where(h >= 0, h, 0.5 * h)
    return h @ w3.T


if __name__ == "__main__":
    # Small shapes consistent with the module's constructor:
    # AutoEncoder(n_input=256, dim1=128, dim2=64, final_dim=32), batch=8.
    B, n_input, dim1, dim2, final_dim = 8, 256, 128, 64, 32

    key = jax.random.PRNGKey(0)
    kx, k1, k2, k3 = jax.random.split(key, 4)

    x = jax.random.normal(kx, (B, final_dim), dtype=jnp.float32)
    # Deterministic synthetic weights (same shapes as nn.Linear(...).weight).
    w1 = jax.random.normal(k1, (dim2, final_dim), dtype=jnp.float32) * 0.1
    w2 = jax.random.normal(k2, (dim1, dim2), dtype=jnp.float32) * 0.1
    w3 = jax.random.normal(k3, (n_input, dim1), dtype=jnp.float32) * 0.1

    # One-time weight preprocessing (transpose + bf16 cast) -- hoisted out of
    # the decode call path.
    w1t, w2t, w3t = prepare_decoder_weights(w1, w2, w3)

    out = autoencoder_decode(x, w1t, w2t, w3t)
    out = jax.block_until_ready(out)
    assert out.shape == (B, n_input), out.shape

    # Tight check against the bf16-emulating reference.
    ref_bf16 = autoencoder_decode_ref_bf16(x, w1, w2, w3)
    assert jnp.allclose(out, ref_bf16, atol=2e-3, rtol=2e-3), float(
        jnp.max(jnp.abs(out - ref_bf16)))

    # Loose sanity check against the full-f32 reference (documents the
    # expected bf16 divergence).
    ref_f32 = autoencoder_decode_ref_f32(x, w1, w2, w3)
    assert jnp.allclose(out, ref_f32, atol=5e-2, rtol=5e-2), float(
        jnp.max(jnp.abs(out - ref_f32)))

    print("KERNEL_OK")
</pallas_src>

<mosaic_0001>
module attributes {stable_mosaic.version = 11 : i64} {
  func.func @decoder_kernel(%arg0: i32, %arg1: memref<8x32xbf16, #tpu.memory_space<vmem>>, %arg2: memref<32x64xbf16, #tpu.memory_space<vmem>>, %arg3: memref<64x128xbf16, #tpu.memory_space<vmem>>, %arg4: memref<128x256xbf16, #tpu.memory_space<vmem>>, %arg5: memref<8x256xf32, #tpu.memory_space<vmem>>) attributes {dimension_semantics = [#tpu.dimension_semantics<parallel>], iteration_bounds = array<i64: 1>, scalar_prefetch = 0 : i64, scratch_operands = 0 : i64, tpu.core_type = #tpu.core_type<tc>, window_params = [{transform_indices = @transform_0, window_bounds = array<i64: 8, 32>}, {pipeline_mode = #tpu.pipeline_mode<synchronous>, transform_indices = @transform_1, window_bounds = array<i64: 32, 64>}, {pipeline_mode = #tpu.pipeline_mode<synchronous>, transform_indices = @transform_2, window_bounds = array<i64: 64, 128>}, {pipeline_mode = #tpu.pipeline_mode<synchronous>, transform_indices = @transform_3, window_bounds = array<i64: 128, 256>}, {transform_indices = @transform_4, window_bounds = array<i64: 8, 256>}]} {
    %c0 = arith.constant 0 : index
    %c0_0 = arith.constant 0 : index
    %0 = vector.load %arg1[%c0, %c0_0] : memref<8x32xbf16, #tpu.memory_space<vmem>>, vector<8x32xbf16>
    %c0_1 = arith.constant 0 : index
    %c0_2 = arith.constant 0 : index
    %1 = vector.load %arg2[%c0_1, %c0_2] : memref<32x64xbf16, #tpu.memory_space<vmem>>, vector<32x64xbf16>
    %cst = arith.constant dense<0.000000e+00> : vector<8x64xf32>
    %2 = tpu.matmul %0, %1, %cst {dimension_numbers = #tpu.dot_dimension_numbers<[1], [0], [0], [1], [0, 0, 1, 1], [], []>} : vector<8x32xbf16>, vector<32x64xbf16>, vector<8x64xf32> -> vector<8x64xf32>
    %cst_3 = arith.constant 5.000000e-01 : f32
    %3 = vector.broadcast %cst_3 : f32 to vector<8x64xf32>
    %4 = arith.mulf %3, %2 : vector<8x64xf32>
    %5 = arith.maximumf %2, %4 : vector<8x64xf32>
    %6 = arith.truncf %5 : vector<8x64xf32> to vector<8x64xbf16>
    %c0_4 = arith.constant 0 : index
    %c0_5 = arith.constant 0 : index
    %7 = vector.load %arg3[%c0_4, %c0_5] : memref<64x128xbf16, #tpu.memory_space<vmem>>, vector<64x128xbf16>
    %cst_6 = arith.constant dense<0.000000e+00> : vector<8x128xf32>
    %8 = tpu.matmul %6, %7, %cst_6 {dimension_numbers = #tpu.dot_dimension_numbers<[1], [0], [0], [1], [0, 0, 1, 1], [], []>} : vector<8x64xbf16>, vector<64x128xbf16>, vector<8x128xf32> -> vector<8x128xf32>
    %cst_7 = arith.constant 5.000000e-01 : f32
    %9 = vector.broadcast %cst_7 : f32 to vector<8x128xf32>
    %10 = arith.mulf %9, %8 : vector<8x128xf32>
    %11 = arith.maximumf %8, %10 : vector<8x128xf32>
    %12 = arith.truncf %11 : vector<8x128xf32> to vector<8x128xbf16>
    %c0_8 = arith.constant 0 : index
    %c0_9 = arith.constant 0 : index
    %13 = vector.load %arg4[%c0_8, %c0_9] : memref<128x256xbf16, #tpu.memory_space<vmem>>, vector<128x256xbf16>
    %cst_10 = arith.constant dense<0.000000e+00> : vector<8x256xf32>
    %14 = tpu.matmul %12, %13, %cst_10 {dimension_numbers = #tpu.dot_dimension_numbers<[1], [0], [0], [1], [0, 0, 1, 1], [], []>} : vector<8x128xbf16>, vector<128x256xbf16>, vector<8x256xf32> -> vector<8x256xf32>
    %c0_11 = arith.constant 0 : index
    %c0_12 = arith.constant 0 : index
    %15 = vector.load %arg5[%c0_11, %c0_12] : memref<8x256xf32, #tpu.memory_space<vmem>>, vector<8x256xf32>
    tpu.vector_store %arg5[%c0_11, %c0_12], %14 {strides = array<i32>} : memref<8x256xf32, #tpu.memory_space<vmem>>, vector<8x256xf32>,
    return
  }
  func.func @transform_0(%arg0: i32) -> (i32, i32) {
    %c0_i32 = arith.constant 0 : i32
    %c0_i32_0 = arith.constant 0 : i32
    return %arg0, %c0_i32 : i32, i32
  }
  func.func @transform_1(%arg0: i32) -> (i32, i32) {
    %c0_i32 = arith.constant 0 : i32
    %c0_i32_0 = arith.constant 0 : i32
    %c0_i32_1 = arith.constant 0 : i32
    return %c0_i32, %c0_i32_0 : i32, i32
  }
  func.func @transform_2(%arg0: i32) -> (i32, i32) {
    %c0_i32 = arith.constant 0 : i32
    %c0_i32_0 = arith.constant 0 : i32
    %c0_i32_1 = arith.constant 0 : i32
    return %c0_i32, %c0_i32_0 : i32, i32
  }
  func.func @transform_3(%arg0: i32) -> (i32, i32) {
    %c0_i32 = arith.constant 0 : i32
    %c0_i32_0 = arith.constant 0 : i32
    %c0_i32_1 = arith.constant 0 : i32
    return %c0_i32, %c0_i32_0 : i32, i32
  }
  func.func @transform_4(%arg0: i32) -> (i32, i32) {
    %c0_i32 = arith.constant 0 : i32
    %c0_i32_0 = arith.constant 0 : i32
    return %arg0, %c0_i32 : i32, i32
  }
}

</mosaic_0001>

<bundles_post_ra>
// kernel: tpu_custom_call.1
= control target key start
LH: loop header
LB: loop body
LE: loop exit
PB: predicated region body
PF: predicated region fallthrough
CT: control target
= control target key end

     0   :  { %9 = vsyncpa [#allocation3], 0  ;;  %s686_s0 = inlined_call_operand.hbm [shape: bf16[8,32], index: 0, kind: input, shape index: {}]   ;;  %s687_s1 = inlined_call_operand.hbm [shape: bf16[32,64], index: 1, kind: input, shape index: {}]   ;;  %s688_s2 = inlined_call_operand.hbm [shape: bf16[64,128], index: 2, kind: input, shape index: {}]   ;;  %s689_s3 = inlined_call_operand.hbm [shape: bf16[128,256], index: 3, kind: input, shape index: {}]   ;;  %s690_s4 = inlined_call_operand.hbm [shape: f32[8,256], index: 4, kind: output, shape index: {}]  }
   0x1   :  { %10 = vsyncpa [#allocation6], 0 }
   0x2   :  { %11 = vsyncpa [#allocation9], 0 }
   0x3   :  { %12 = vsyncpa [#allocation4], 0  ;;  %s583_s15 = smov [#allocation5]   ;;  %s465_s19 = scalar_lea.hbm %s687_s1, 256 }
   0x4   :  { %s28_s16 = sshll.u32 %s583_s15, 4  ;;  %p466_p0 = scmp.ne.s32.totalorder %s687_s1, %s465_s19  ;;  %s29_s16 = int_to_ptr.vmem [resolvable:$true] %s28_s16 }
   0x5   :  { %p469_p1 = scmp.lt.u32.totalorder %s465_s19, %s687_s1 }
   0x7   :  { %p471_p2 = pnand %p469_p1, %p466_p0 }
   0x9   :  { %474 = shalt.err (!%p471_p2)
}
   0xa   :  { %s475_s24 = scalar_lea.vmem %s29_s16, 256  ;;  %p480_p4 = scmp.lt.s32.totalorder %s29_s16, %s29_s16 }
   0xb   :  { %p476_p3 = scmp.ne.s32.totalorder %s29_s16, %s475_s24  ;;  %p481_p5 = scmp.lt.s32.totalorder %s475_s24, %s475_s24 }
   0xd   :  { %p482_p6 = por %p481_p5, %p480_p4 }
   0xf   :  { %p483_p7 = pnand %p482_p6, %p476_p3 }
  0x11   :  { %486 = shalt.err (!%p483_p7)
}
  0x12   :  { %s584_s25 = smov 64   ;;  %s585_s26 = smov 4  }
  0x13   :  { %34 = dma.hbm_to_vmem [thread:$0]  %s687_s1, 256, %s29_s16, [#allocation6], %s584_s25, %s584_s25, %s585_s26  }
  0x14   :  { %s586_s29 = smov [#allocation2]   ;;  %s587_s5 = smov [#allocation7]  }
  0x15   :  { %s19_s30 = sshll.u32 %s586_s29, 4  ;;  %s40_s6 = sshll.u32 %s587_s5, 4  ;;  %s20_s30 = int_to_ptr.vmem [resolvable:$true] %s19_s30  ;;  %s41_s6 = int_to_ptr.vmem [resolvable:$true] %s40_s6 }
  0x16   :  { %s487_s9 = scalar_lea.hbm %s686_s0, 64 }
  0x17   :  { %p488_p8 = scmp.ne.s32.totalorder %s686_s0, %s487_s9  ;;  %p491_p9 = scmp.lt.u32.totalorder %s487_s9, %s686_s0 }
  0x19   :  { %p493_p10 = pnand %p491_p9, %p488_p8 }
  0x1b   :  { %496 = shalt.err (!%p493_p10)
}
  0x1c   :  { %s497_s1 = scalar_lea.vmem %s20_s30, 64  ;;  %p502_p12 = scmp.lt.s32.totalorder %s20_s30, %s20_s30 }
  0x1d   :  { %p498_p11 = scmp.ne.s32.totalorder %s20_s30, %s497_s1  ;;  %p503_p13 = scmp.lt.s32.totalorder %s497_s1, %s497_s1 }
  0x1f   :  { %p504_p0 = por %p503_p13, %p502_p12 }
  0x21   :  { %p505_p1 = pnand %p504_p0, %p498_p11 }
  0x23   :  { %508 = shalt.err (!%p505_p1)
}
  0x24   :  { %22 = dma.hbm_to_vmem [thread:$0]  %s686_s0, 64, %s20_s30, [#allocation3]  }
  0x25   :  { %s509_s18 = scalar_lea.hbm %s688_s2, 512 }
  0x26   :  { %p510_p2 = scmp.ne.s32.totalorder %s688_s2, %s509_s18  ;;  %p513_p3 = scmp.lt.u32.totalorder %s509_s18, %s688_s2 }
  0x28   :  { %p515_p4 = pnand %p513_p3, %p510_p2 }
  0x2a   :  { %518 = shalt.err (!%p515_p4)
}
  0x2b   :  { %s519_s23 = scalar_lea.vmem %s41_s6, 512  ;;  %p524_p6 = scmp.lt.s32.totalorder %s41_s6, %s41_s6 }
  0x2c   :  { %p520_p5 = scmp.ne.s32.totalorder %s41_s6, %s519_s23  ;;  %p525_p7 = scmp.lt.s32.totalorder %s519_s23, %s519_s23 }
  0x2e   :  { %p526_p8 = por %p525_p7, %p524_p6 }
  0x30   :  { %p527_p9 = pnand %p526_p8, %p520_p5 }
  0x32   :  { %530 = shalt.err (!%p527_p9)
}
  0x33   :  { %46 = dma.hbm_to_vmem [thread:$0]  %s688_s2, 512, %s41_s6, [#allocation6], %s584_s25, %s584_s25, %s585_s26  }
  0x34   :  { %s588_s27 = smov [#allocation8]   ;;  %s531_s5 = scalar_lea.hbm %s689_s3, 2048 }
  0x35   :  { %s52_s28 = sshll.u32 %s588_s27, 4  ;;  %p532_p10 = scmp.ne.s32.totalorder %s689_s3, %s531_s5  ;;  %s53_s28 = int_to_ptr.vmem [resolvable:$true] %s52_s28 }
  0x36   :  { %p535_p11 = scmp.lt.u32.totalorder %s531_s5, %s689_s3 }
  0x38   :  { %p537_p12 = pnand %p535_p11, %p532_p10 }
  0x3a   :  { %540 = shalt.err (!%p537_p12)
}
  0x3b   :  { %s541_s11 = scalar_lea.vmem %s53_s28, 2048  ;;  %p546_p0 = scmp.lt.s32.totalorder %s53_s28, %s53_s28 }
  0x3c   :  { %p542_p13 = scmp.ne.s32.totalorder %s53_s28, %s541_s11  ;;  %p547_p1 = scmp.lt.s32.totalorder %s541_s11, %s541_s11 }
  0x3e   :  { %p548_p2 = por %p547_p1, %p546_p0 }
  0x40   :  { %p549_p3 = pnand %p548_p2, %p542_p13 }
  0x42   :  { %552 = shalt.err (!%p549_p3)
}
  0x43   :  { %s589_s2 = smov 128   ;;  %s590_s25 = smov 8  }
  0x44   :  { %58 = dma.hbm_to_vmem [thread:$0]  %s689_s3, 2048, %s53_s28, [#allocation9], %s589_s2, %s589_s2, %s590_s25  }
  0x45   :  { %575 = dma.done.wait [#allocation3], 64  }
  0x46   :  { %576 = vsyncadd [#allocation3], 4294967232 }
  0x47   :  { %577 = dma.done.wait [#allocation6], 768  }
  0x48   :  { %578 = vsyncadd [#allocation6], 4294966528 }
  0x49   :  { %579 = dma.done.wait [#allocation9], 2048  }
  0x4a   :  { %580 = vsyncadd [#allocation9], 4294965248  ;;  %v591_v0 = vmov 0.0   ;;  %vm592_vm0 = vmmov 0   ;;  %v435_v1 = vld [vmem:[#allocation5] sm:$0xff]   ;;  %v436_v2 = vld [vmem:[#allocation5 + $0x8] sm:$0xff]  }
  0x4b   :  { %403 = vmatprep.subr.bf16.mxu1 %v591_v0  ;;  %407 = vmatprep.mubr.msk.bf16.mxu1 %vm592_vm0, %v591_v0  ;;  %v72_v3 = vld [vmem:[#allocation2] sm:$0xf]  ;;  %v437_v4 = vld [vmem:[#allocation7] sm:$0xff]   ;;  %vm89_vm1 = vcmask 261120   ;;  %v439_v6 = vld [vmem:[#allocation7 + $0x10] sm:$0xff]   ;;  %vm168_vm2 = vcmask 523264  }
  0x4c   :  { %404 = vmatpush3.bf16.msra.mxu1 %v435_v1  ;;  %v438_v5 = vld [vmem:[#allocation7 + $0x8] sm:$0xff]   ;;  %v440_v7 = vld [vmem:[#allocation7 + $0x18] sm:$0xff]   ;;  %v593_v31 = vmov 0   ;;  %s594_s3 = smov [#allocation10]  }
  0x4d   :  { %405 = vmatprep.subr.bf16.mxu1 %v591_v0  ;;  %v441_v8 = vld [vmem:[#allocation8 + $0x4] ss:$8 sps:$4 sm:$0xff]   ;;  %v443_v9 = vld [vmem:[#allocation8] ss:$8 sps:$4 sm:$0xff]   ;;  %v444_v10 = vld [vmem:[#allocation8 + $0x14] ss:$8 sps:$4 sm:$0xff]   ;;  %343 = vmatprep.mubr.bf16.mxu0 %v593_v31 }
  0x4e   :  { %311 = vmatprep.subr.bf16.mxu0 %v441_v8  ;;  %v446_v11 = vld [vmem:[#allocation8 + $0x10] ss:$8 sps:$4 sm:$0xff]   ;;  %v447_v12 = vld [vmem:[#allocation8 + $0x24] ss:$8 sps:$4 sm:$0xff]   ;;  %v449_v13 = vld [vmem:[#allocation8 + $0x20] ss:$8 sps:$4 sm:$0xff]  }
  0x4f   :  { %312 = vmatpush1.bf16.msra.mxu0 %v443_v9  ;;  %v450_v14 = vld [vmem:[#allocation8 + $0x34] ss:$8 sps:$4 sm:$0xff]   ;;  %v452_v15 = vld [vmem:[#allocation8 + $0x30] ss:$8 sps:$4 sm:$0xff]   ;;  %v453_v16 = vld [vmem:[#allocation8 + $0x44] ss:$8 sps:$4 sm:$0xff]  }
  0x50   :  { %406 = vmatpush3.bf16.msra.mxu1 %v436_v2  ;;  %313 = vmatprep.subr.bf16.mxu0 %v444_v10  ;;  %v455_v17 = vld [vmem:[#allocation8 + $0x40] ss:$8 sps:$4 sm:$0xff]   ;;  %v456_v18 = vld [vmem:[#allocation8 + $0x54] ss:$8 sps:$4 sm:$0xff]   ;;  %v458_v19 = vld [vmem:[#allocation8 + $0x50] ss:$8 sps:$4 sm:$0xff]  }
  0x51   :  { %411 = vmatprep.subr.bf16.mxu1 %v591_v0  ;;  %v459_v20 = vld [vmem:[#allocation8 + $0x64] ss:$8 sps:$4 sm:$0xff]   ;;  %v461_v28 = vld [vmem:[#allocation8 + $0x60] ss:$8 sps:$4 sm:$0xff]   ;;  %v462_v29 = vld [vmem:[#allocation8 + $0x74] ss:$8 sps:$4 sm:$0xff]  }
  0x52   :  { %v464_v30 = vld [vmem:[#allocation8 + $0x70] ss:$8 sps:$4 sm:$0xff]   ;;  %s360_s12 = sshll.u32 %s594_s3, 4  ;;  %s361_s12 = int_to_ptr.vmem [resolvable:$true] %s360_s12 }
  0x53   :  { %408 = vmatmul.mubr.msk.bf16.vlgmr.msra.gmra.mrb[0].mxu1 %vm89_vm1, %v72_v3  ;;  %314 = vmatpush1.bf16.msra.mxu0 %v446_v11  ;;  %s553_s13 = scalar_lea.vmem %s361_s12, 256  ;;  %p558_p5 = scmp.lt.s32.totalorder %s361_s12, %s361_s12 }
  0x54   :  { %412 = vmatpush3.bf16.msra.mxu1 %v437_v4  ;;  %419 = vmatprep.mubr.msk.bf16.mxu1 %vm592_vm0, %v591_v0  ;;  %p554_p4 = scmp.ne.s32.totalorder %s361_s12, %s553_s13  ;;  %p559_p6 = scmp.lt.s32.totalorder %s553_s13, %s553_s13 }
  0x55   :  { %413 = vmatprep.subr.bf16.mxu1 %v591_v0  ;;  %315 = vmatprep.subr.bf16.mxu0 %v447_v12 }
  0x56   :  { %p560_p7 = por %p559_p6, %p558_p5 }
  0x57   :  { %316 = vmatpush1.bf16.msra.mxu0 %v449_v13 }
  0x58   :  { %414 = vmatpush3.bf16.msra.mxu1 %v438_v5  ;;  %317 = vmatprep.subr.bf16.mxu0 %v450_v14  ;;  %p561_p8 = pnand %p560_p7, %p554_p4 }
  0x59   :  { %415 = vmatprep.subr.bf16.mxu1 %v591_v0 }
  0x5b   :  { %318 = vmatpush1.bf16.msra.mxu0 %v452_v15 }
  0x5c   :  { %416 = vmatpush3.bf16.msra.mxu1 %v439_v6  ;;  %319 = vmatprep.subr.bf16.mxu0 %v453_v16 }
  0x5d   :  { %417 = vmatprep.subr.bf16.mxu1 %v591_v0 }
  0x5f   :  { %320 = vmatpush1.bf16.msra.mxu0 %v455_v17 }
  0x60   :  { %418 = vmatpush3.bf16.msra.mxu1 %v440_v7  ;;  %321 = vmatprep.subr.bf16.mxu0 %v456_v18 }
  0x63   :  { %322 = vmatpush1.bf16.msra.mxu0 %v458_v19 }
  0x64   :  { %323 = vmatprep.subr.bf16.mxu0 %v459_v20 }
  0x67   :  { %324 = vmatpush1.bf16.msra.mxu0 %v461_v28 }
  0x68   :  { %325 = vmatprep.subr.bf16.mxu0 %v462_v29 }
  0x6b   :  { %326 = vmatpush1.bf16.msra.mxu0 %v464_v30 }
 0x126   :  { %v127_v21 = vpop.f32.mrb[0].mxu1 }
 0x127   :  { %v133_v22 = vmul.f32 0.5, %v127_v21  ;;  %v409_v23 = vpop.f32.mrb[1].mxu1 }
 0x128   :  { %v130_v24 = vpop.f32.mrb[2].mxu1 }
 0x129   :  { %v134_v25 = vmax.f32 %v127_v21, %v133_v22  ;;  %v410_v26 = vpop.f32.mrb[3].mxu1 }
 0x12b   :  { %v135_v27 = vpack.c.bf16 %v134_v25, %v134_v25 }
 0x12d   :  { %420 = vmatmul.mubr.msk.bf16.vlgmr.msra.gmra.mrb[4].mxu1 %vm168_vm2, %v135_v27 }
 0x200   :  { %v206_v32 = vpop.f32.mrb[4].mxu1 }
 0x201   :  { %v212_v33 = vmul.f32 0.5, %v206_v32  ;;  %v421_v34 = vpop.f32.mrb[5].mxu1 }
 0x202   :  { %v209_v35 = vpop.f32.mrb[6].mxu1 }
 0x203   :  { %v213_v36 = vmax.f32 %v206_v32, %v212_v33  ;;  %v422_v37 = vpop.f32.mrb[7].mxu1 }
 0x205   :  { %v214_v38 = vpack.c.bf16 %v213_v36, %v213_v36 }
 0x207   :  { %344 = vmatmul.mubr.bf16.vlgmr.msra.gmra.mrb[0].mxu0 %v214_v38 }
 0x2da   :  { %v345_v39 = vpop.f32.mrb[0].mxu0 }
 0x2db   :  { %352 = vst [vmem:[#allocation10] sm:$0xff] %v345_v39  ;;  %v347_v40 = vpop.f32.mrb[1].mxu0 }
 0x2dc   :  { %353 = vst [vmem:[#allocation10 + $0x8] sm:$0xff] %v347_v40  ;;  %v349_v41 = vpop.f32.mrb[2].mxu0 }
 0x2dd   :  { %v350_v42 = vpop.f32.mrb[3].mxu0 }
 0x2de   :  { %564 = shalt.err (!%p561_p8)
}
 0x2df   :  { %s565_s15 = scalar_lea.hbm %s690_s4, 256 }
 0x2e0   :  { %p566_p9 = scmp.ne.s32.totalorder %s690_s4, %s565_s15  ;;  %p569_p10 = scmp.lt.u32.totalorder %s565_s15, %s690_s4 }
 0x2e2   :  { %p571_p11 = pnand %p569_p10, %p566_p9 }
 0x2e4   :  { %574 = shalt.err (!%p571_p11)
}
 0x2e5   :  { %363 = dma.vmem_to_hbm [thread:$0]  %s361_s12, 256, %s690_s4, [#allocation4]  }
 0x2e6   :  { %581 = dma.done.wait [#allocation4], 256  }
 0x2e7   :  { %582 = vsyncadd [#allocation4], 4294967040 }
 0x2e8   :  { %367 = vsyncpa [#allocation3], 1 }
 0x2e9   :  { %368 = vsyncpa [#allocation6], 1 }
 0x2ea   :  { %369 = vsyncpa [#allocation9], 1 }
 0x2eb   :  { %370 = vsyncpa [#allocation4], 1 }

</bundles_post_ra>
